<compile_context>
chip_gen: v7x
topology: tpu7x:2x2x1
jax: 0.10.0
libtpu: 0.0.40
codegen_flags: <defaults>
</compile_context>

<pallas_src>
import jax
import jax.numpy as jnp
from jax.experimental import pallas as pl
from jax.experimental.pallas import tpu as pltpu

B, S, D, H, DFF = 2, 8, 32, 4, 64
DK = D // H
BS = B * S
EPS = 1e-5  # nn.LayerNorm default

# Row layout of the packed (8, 128) vector-parameter tile.
_ROW_BQKV, _ROW_BO, _ROW_B1, _ROW_B2 = 0, 1, 2, 3
_ROW_G1, _ROW_BE1, _ROW_G2, _ROW_BE2 = 4, 5, 6, 7


def _recip(v):
    # EUP approximate reciprocal + one Newton step -> ~f32-exact, no VPU divide.
    r = pl.reciprocal(v, approx=True)
    return r * (jnp.float32(2.0) - v * r)


def _rsqrt(v):
    # EUP rsqrt + one Newton step -> ~f32-exact.
    r = jax.lax.rsqrt(v)
    return r * (jnp.float32(1.5) - jnp.float32(0.5) * v * r * r)


def encoder_layer_kernel(x_ref, mask_ref, wqkv_ref, wo_ref, w1_ref, w2_ref,
                         vec_ref, out_ref):
    x2 = x_ref[...]                                   # (B*S, D)
    vec = vec_ref[...]                                # (8, 128) packed vector params
    bqkv = vec[_ROW_BQKV:_ROW_BQKV + 1, :3 * D]       # (1, 3D)
    bo = vec[_ROW_BO:_ROW_BO + 1, :D]                 # (1, D)
    b1 = vec[_ROW_B1:_ROW_B1 + 1, :DFF]               # (1, DFF)
    b2 = vec[_ROW_B2:_ROW_B2 + 1, :D]
    g1 = vec[_ROW_G1:_ROW_G1 + 1, :D]
    be1 = vec[_ROW_BE1:_ROW_BE1 + 1, :D]
    g2 = vec[_ROW_G2:_ROW_G2 + 1, :D]
    be2 = vec[_ROW_BE2:_ROW_BE2 + 1, :D]

    # Mask bias computed ONCE (hoisted out of the head loop): one compare+select,
    # then a single add per head.
    mask_bias = jnp.where(mask_ref[...] == jnp.float32(0.0),
                          jnp.float32(-1e9), jnp.float32(0.0))   # (B, S, S)

    # --- fused QKV projection: one (B*S, D) @ (D, 3D) MXU pass ---------------
    # (1/sqrt(d_k) is already folded into the Q columns of wqkv / bqkv.)
    qkv = jnp.dot(x2, wqkv_ref[...],
                  preferred_element_type=jnp.float32) + bqkv
    qkv3 = qkv.reshape(B, S, 3 * D)    # leading-dim split only (sublane-aligned)

    # --- multi-head self-attention -------------------------------------------
    # Heads statically unrolled; per-head contexts are lane-concatenated into one
    # (B*S, D) tile and pushed through W_o with a single MXU matmul.
    ctxs = []
    for h in range(H):
        qh = qkv3[:, :, h * DK:(h + 1) * DK]                     # (B, S, DK)
        kh = qkv3[:, :, D + h * DK:D + (h + 1) * DK]
        vh = qkv3[:, :, 2 * D + h * DK:2 * D + (h + 1) * DK]
        s = jnp.einsum('bqd,bkd->bqk', qh, kh,
                       preferred_element_type=jnp.float32)       # (B, S, S)
        s = s + mask_bias
        s = s - jnp.max(s, axis=-1, keepdims=True)
        e = jnp.exp(s)
        p = e * _recip(jnp.sum(e, axis=-1, keepdims=True))
        ctx = jnp.einsum('bqk,bkd->bqd', p, vh,
                         preferred_element_type=jnp.float32)     # (B, S, DK)
        ctxs.append(ctx.reshape(BS, DK))
    ctx_all = jnp.concatenate(ctxs, axis=-1)                     # (B*S, D)
    attn2 = jnp.dot(ctx_all, wo_ref[...],
                    preferred_element_type=jnp.float32) + bo

    # TODO(synk): dropout implemented as identity (eval-mode semantics);
    # training-mode RNG dropout (pltpu.prng_seed / prng_random_bits) is omitted.

    # --- residual + LayerNorm 1 ----------------------------------------------
    h1 = x2 + attn2
    mu1 = jnp.mean(h1, axis=-1, keepdims=True)
    var1 = jnp.mean((h1 - mu1) ** 2, axis=-1, keepdims=True)
    x1 = (h1 - mu1) * _rsqrt(var1 + jnp.float32(EPS)) * g1 + be1

    # --- position-wise feed-forward ------------------------------------------
    ff = jnp.dot(x1, w1_ref[...], preferred_element_type=jnp.float32) + b1
    ff = jnp.maximum(ff, jnp.float32(0.0))
    ff = jnp.dot(ff, w2_ref[...], preferred_element_type=jnp.float32) + b2

    # --- residual + LayerNorm 2 ----------------------------------------------
    h2 = x1 + ff
    mu2 = jnp.mean(h2, axis=-1, keepdims=True)
    var2 = jnp.mean((h2 - mu2) ** 2, axis=-1, keepdims=True)
    out_ref[...] = (h2 - mu2) * _rsqrt(var2 + jnp.float32(EPS)) * g2 + be2


def fuse_params(p):
    """One-time parameter fusion (kept OUT of the per-call hot path)."""
    scale = jnp.float32(1.0 / (DK ** 0.5))
    # Fold the 1/sqrt(d_k) attention scale into W_q / b_q and fuse Q/K/V.
    wqkv = jnp.concatenate([p["wq"] * scale, p["wk"], p["wv"]], axis=1)   # (D, 3D)
    bqkv = jnp.concatenate([p["bq"] * scale, p["bk"], p["bv"]], axis=1)   # (1, 3D)
    # Pack all tiny vector parameters into a single (8, 128) tile.
    vec = jnp.zeros((8, 128), jnp.float32)
    vec = vec.at[_ROW_BQKV, :3 * D].set(bqkv[0])
    vec = vec.at[_ROW_BO, :D].set(p["bo"][0])
    vec = vec.at[_ROW_B1, :DFF].set(p["b1"][0])
    vec = vec.at[_ROW_B2, :D].set(p["b2"][0])
    vec = vec.at[_ROW_G1, :D].set(p["g1"][0])
    vec = vec.at[_ROW_BE1, :D].set(p["be1"][0])
    vec = vec.at[_ROW_G2, :D].set(p["g2"][0])
    vec = vec.at[_ROW_BE2, :D].set(p["be2"][0])
    return dict(wqkv=wqkv, wo=p["wo"], w1=p["w1"], w2=p["w2"], vec=vec)


@jax.jit
def encoder_layer(x, mask, fp):
    x2 = x.reshape(BS, D)
    operands = (x2, mask, fp["wqkv"], fp["wo"], fp["w1"], fp["w2"], fp["vec"])

    flops = (2 * BS * D * 3 * D                 # fused QKV projection
             + H * 2 * (2 * B * S * S * DK)     # per-head scores + probs @ V
             + 2 * BS * D * D                   # single W_o projection
             + 2 * BS * D * DFF                 # FFN fc1
             + 2 * BS * DFF * D)                # FFN fc2
    transcendentals = B * H * S * S + B * H * S + 2 * BS
    bytes_accessed = sum(int(a.size) * 4 for a in operands) + BS * D * 4

    vmem = pl.BlockSpec(memory_space=pltpu.MemorySpace.VMEM)
    out2 = pl.pallas_call(
        encoder_layer_kernel,
        out_shape=jax.ShapeDtypeStruct((BS, D), jnp.float32),
        in_specs=[vmem] * len(operands),
        out_specs=vmem,
        cost_estimate=pl.CostEstimate(flops=flops,
                                      transcendentals=transcendentals,
                                      bytes_accessed=bytes_accessed),
    )(*operands)
    return out2.reshape(B, S, D)


# ------------------------------ pure-JAX reference ---------------------------
def ref_encoder_layer(x, mask, p):
    def ln(h, g, b):
        mu = jnp.mean(h, axis=-1, keepdims=True)
        var = jnp.mean((h - mu) ** 2, axis=-1, keepdims=True)
        return (h - mu) / jnp.sqrt(var + EPS) * g + b

    q = x @ p["wq"] + p["bq"]
    k = x @ p["wk"] + p["bk"]
    v = x @ p["wv"] + p["bv"]

    def split(t):  # (B, H, S, DK)
        return t.reshape(B, S, H, DK).transpose(0, 2, 1, 3)

    qh, kh, vh = split(q), split(k), split(v)
    scores = jnp.einsum("bhqd,bhkd->bhqk", qh, kh) / jnp.sqrt(jnp.float32(DK))
    scores = jnp.where(mask[:, None, :, :] == 0, -1e9, scores)
    probs = jax.nn.softmax(scores, axis=-1)
    attn = jnp.einsum("bhqk,bhkd->bhqd", probs, vh)
    attn = attn.transpose(0, 2, 1, 3).reshape(B, S, D)
    attn = attn @ p["wo"] + p["bo"]
    x1 = ln(x + attn, p["g1"], p["be1"])
    ff = jnp.maximum(x1 @ p["w1"] + p["b1"], 0.0) @ p["w2"] + p["b2"]
    return ln(x1 + ff, p["g2"], p["be2"])


def init_params(key):
    ks = jax.random.split(key, 12)

    def linear(kw, kb, fan_in, fan_out):
        bound = 1.0 / (fan_in ** 0.5)
        w = jax.random.uniform(kw, (fan_in, fan_out), jnp.float32, -bound, bound)
        b = jax.random.uniform(kb, (1, fan_out), jnp.float32, -bound, bound)
        return w, b

    wq, bq = linear(ks[0], ks[1], D, D)
    wk, bk = linear(ks[2], ks[3], D, D)
    wv, bv = linear(ks[4], ks[5], D, D)
    wo, bo = linear(ks[6], ks[7], D, D)
    w1, b1 = linear(ks[8], ks[9], D, DFF)
    w2, b2 = linear(ks[10], ks[11], DFF, D)
    return dict(
        wq=wq, bq=bq, wk=wk, bk=bk, wv=wv, bv=bv, wo=wo, bo=bo,
        w1=w1, b1=b1, w2=w2, b2=b2,
        g1=jnp.ones((1, D), jnp.float32), be1=jnp.zeros((1, D), jnp.float32),
        g2=jnp.ones((1, D), jnp.float32), be2=jnp.zeros((1, D), jnp.float32),
    )


if __name__ == "__main__":
    key = jax.random.PRNGKey(0)
    k_x, k_p = jax.random.split(key)
    x = jax.random.normal(k_x, (B, S, D), jnp.float32)
    # attention mask: 1 = attend, 0 = masked; mask out last 2 key positions of batch 1
    mask = jnp.ones((B, S, S), jnp.float32)
    mask = mask.at[1, :, S - 2:].set(0.0)
    params = init_params(k_p)
    fused = fuse_params(params)   # one-time parameter fusion, not on the hot path

    out = encoder_layer(x, mask, fused)
    out = jax.block_until_ready(out)

    ref = ref_encoder_layer(x, mask, params)
    assert out.shape == (B, S, D)
    # Slightly looser than pure-f32 tolerance: softmax/LayerNorm use EUP
    # approximations refined with one Newton step (~f32 accuracy).
    assert jnp.allclose(out, ref, rtol=2e-4, atol=2e-4), (
        f"max abs err {jnp.max(jnp.abs(out - ref))}")
    print("KERNEL_OK")
</pallas_src>

<mosaic_0001>
module attributes {stable_mosaic.version = 11 : i64} {
  func.func @encoder_layer_kernel(%arg0: memref<16x32xf32, #tpu.memory_space<vmem>>, %arg1: memref<2x8x8xf32, #tpu.memory_space<vmem>>, %arg2: memref<32x96xf32, #tpu.memory_space<vmem>>, %arg3: memref<32x32xf32, #tpu.memory_space<vmem>>, %arg4: memref<32x64xf32, #tpu.memory_space<vmem>>, %arg5: memref<64x32xf32, #tpu.memory_space<vmem>>, %arg6: memref<8x128xf32, #tpu.memory_space<vmem>>, %arg7: memref<16x32xf32, #tpu.memory_space<vmem>>) attributes {dimension_semantics = [], scalar_prefetch = 0 : i64, scratch_operands = 0 : i64, tpu.core_type = #tpu.core_type<tc>} {
    %c0 = arith.constant 0 : index
    %c0_0 = arith.constant 0 : index
    %0 = vector.load %arg0[%c0, %c0_0] : memref<16x32xf32, #tpu.memory_space<vmem>>, vector<16x32xf32>
    %c0_1 = arith.constant 0 : index
    %c0_2 = arith.constant 0 : index
    %1 = vector.load %arg6[%c0_1, %c0_2] : memref<8x128xf32, #tpu.memory_space<vmem>>, vector<8x128xf32>
    %2 = vector.extract_strided_slice %1 {offsets = [0, 0], sizes = [1, 96], strides = [1, 1]} : vector<8x128xf32> to vector<1x96xf32>
    %3 = vector.extract_strided_slice %1 {offsets = [1, 0], sizes = [1, 32], strides = [1, 1]} : vector<8x128xf32> to vector<1x32xf32>
    %4 = vector.extract_strided_slice %1 {offsets = [2, 0], sizes = [1, 64], strides = [1, 1]} : vector<8x128xf32> to vector<1x64xf32>
    %5 = vector.extract_strided_slice %1 {offsets = [3, 0], sizes = [1, 32], strides = [1, 1]} : vector<8x128xf32> to vector<1x32xf32>
    %6 = vector.extract_strided_slice %1 {offsets = [4, 0], sizes = [1, 32], strides = [1, 1]} : vector<8x128xf32> to vector<1x32xf32>
    %7 = vector.extract_strided_slice %1 {offsets = [5, 0], sizes = [1, 32], strides = [1, 1]} : vector<8x128xf32> to vector<1x32xf32>
    %8 = vector.extract_strided_slice %1 {offsets = [6, 0], sizes = [1, 32], strides = [1, 1]} : vector<8x128xf32> to vector<1x32xf32>
    %9 = vector.extract_strided_slice %1 {offsets = [7, 0], sizes = [1, 32], strides = [1, 1]} : vector<8x128xf32> to vector<1x32xf32>
    %c0_3 = arith.constant 0 : index
    %c0_4 = arith.constant 0 : index
    %c0_5 = arith.constant 0 : index
    %10 = vector.load %arg1[%c0_3, %c0_4, %c0_5] : memref<2x8x8xf32, #tpu.memory_space<vmem>>, vector<2x8x8xf32>
    %cst = arith.constant 0.000000e+00 : f32
    %11 = vector.broadcast %cst : f32 to vector<2x8x8xf32>
    %12 = arith.cmpf oeq, %10, %11 : vector<2x8x8xf32>
    %cst_6 = arith.constant -1.000000e+09 : f32
    %cst_7 = arith.constant 0.000000e+00 : f32
    %13 = vector.broadcast %cst_6 : f32 to vector<2x8x8xf32>
    %14 = vector.broadcast %cst_7 : f32 to vector<2x8x8xf32>
    %15 = arith.select %12, %13, %14 : vector<2x8x8xi1>, vector<2x8x8xf32>
    %c0_8 = arith.constant 0 : index
    %c0_9 = arith.constant 0 : index
    %16 = vector.load %arg2[%c0_8, %c0_9] : memref<32x96xf32, #tpu.memory_space<vmem>>, vector<32x96xf32>
    %cst_10 = arith.constant dense<0.000000e+00> : vector<16x96xf32>
    %17 = tpu.matmul %0, %16, %cst_10 {dimension_numbers = #tpu.dot_dimension_numbers<[1], [0], [0], [1], [0, 0, 1, 1], [], []>} : vector<16x32xf32>, vector<32x96xf32>, vector<16x96xf32> -> vector<16x96xf32>
    %18 = vector.broadcast %2 : vector<1x96xf32> to vector<16x96xf32>
    %19 = arith.addf %17, %18 : vector<16x96xf32>
    %20 = vector.shape_cast %19 : vector<16x96xf32> to vector<2x8x96xf32>
    %21 = vector.extract_strided_slice %20 {offsets = [0, 0, 0], sizes = [2, 8, 8], strides = [1, 1, 1]} : vector<2x8x96xf32> to vector<2x8x8xf32>
    %22 = vector.extract_strided_slice %20 {offsets = [0, 0, 32], sizes = [2, 8, 8], strides = [1, 1, 1]} : vector<2x8x96xf32> to vector<2x8x8xf32>
    %23 = vector.extract_strided_slice %20 {offsets = [0, 0, 64], sizes = [2, 8, 8], strides = [1, 1, 1]} : vector<2x8x96xf32> to vector<2x8x8xf32>
    "tpu.trace_start"() <{level = 10 : i32, message = "bqd,bkd->bqk"}> : () -> ()
    %cst_11 = arith.constant dense<0.000000e+00> : vector<2x8x8xf32>
    %24 = tpu.matmul %21, %22, %cst_11 {dimension_numbers = #tpu.dot_dimension_numbers<[2], [2], [1], [1], [0, 0, 0, 1, 1, 1], [0], [0]>} : vector<2x8x8xf32>, vector<2x8x8xf32>, vector<2x8x8xf32> -> vector<2x8x8xf32>
    "tpu.trace_stop"() : () -> ()
    %25 = arith.addf %24, %15 : vector<2x8x8xf32>
    %cst_12 = arith.constant dense<0xFF800000> : vector<2x8xf32>
    %26 = vector.multi_reduction <maximumf>, %25, %cst_12 [2] : vector<2x8x8xf32> to vector<2x8xf32>
    %27 = vector.shape_cast %26 : vector<2x8xf32> to vector<2x8x1xf32>
    %28 = vector.broadcast %27 : vector<2x8x1xf32> to vector<2x8x8xf32>
    %29 = arith.subf %25, %28 : vector<2x8x8xf32>
    %30 = math.exp %29 : vector<2x8x8xf32>
    %cst_13 = arith.constant dense<0.000000e+00> : vector<2x8xf32>
    %31 = vector.multi_reduction <add>, %30, %cst_13 [2] : vector<2x8x8xf32> to vector<2x8xf32>
    %32 = vector.shape_cast %31 : vector<2x8xf32> to vector<2x8x1xf32>
    %33 = tpu.reciprocal %32 {approx = true} : vector<2x8x1xf32> -> vector<2x8x1xf32>
    %34 = arith.mulf %32, %33 : vector<2x8x1xf32>
    %cst_14 = arith.constant 2.000000e+00 : f32
    %35 = vector.broadcast %cst_14 : f32 to vector<2x8x1xf32>
    %36 = arith.subf %35, %34 : vector<2x8x1xf32>
    %37 = arith.mulf %33, %36 : vector<2x8x1xf32>
    %38 = vector.broadcast %37 : vector<2x8x1xf32> to vector<2x8x8xf32>
    %39 = arith.mulf %30, %38 : vector<2x8x8xf32>
    "tpu.trace_start"() <{level = 10 : i32, message = "bqk,bkd->bqd"}> : () -> ()
    %cst_15 = arith.constant dense<0.000000e+00> : vector<2x8x8xf32>
    %40 = tpu.matmul %39, %23, %cst_15 {dimension_numbers = #tpu.dot_dimension_numbers<[2], [1], [1], [2], [0, 0, 0, 1, 1, 2], [0], [0]>} : vector<2x8x8xf32>, vector<2x8x8xf32>, vector<2x8x8xf32> -> vector<2x8x8xf32>
    "tpu.trace_stop"() : () -> ()
    %41 = vector.shape_cast %40 : vector<2x8x8xf32> to vector<16x8xf32>
    %42 = vector.extract_strided_slice %20 {offsets = [0, 0, 8], sizes = [2, 8, 8], strides = [1, 1, 1]} : vector<2x8x96xf32> to vector<2x8x8xf32>
    %43 = vector.extract_strided_slice %20 {offsets = [0, 0, 40], sizes = [2, 8, 8], strides = [1, 1, 1]} : vector<2x8x96xf32> to vector<2x8x8xf32>
    %44 = vector.extract_strided_slice %20 {offsets = [0, 0, 72], sizes = [2, 8, 8], strides = [1, 1, 1]} : vector<2x8x96xf32> to vector<2x8x8xf32>
    "tpu.trace_start"() <{level = 10 : i32, message = "bqd,bkd->bqk"}> : () -> ()
    %cst_16 = arith.constant dense<0.000000e+00> : vector<2x8x8xf32>
    %45 = tpu.matmul %42, %43, %cst_16 {dimension_numbers = #tpu.dot_dimension_numbers<[2], [2], [1], [1], [0, 0, 0, 1, 1, 1], [0], [0]>} : vector<2x8x8xf32>, vector<2x8x8xf32>, vector<2x8x8xf32> -> vector<2x8x8xf32>
    "tpu.trace_stop"() : () -> ()
    %46 = arith.addf %45, %15 : vector<2x8x8xf32>
    %cst_17 = arith.constant dense<0xFF800000> : vector<2x8xf32>
    %47 = vector.multi_reduction <maximumf>, %46, %cst_17 [2] : vector<2x8x8xf32> to vector<2x8xf32>
    %48 = vector.shape_cast %47 : vector<2x8xf32> to vector<2x8x1xf32>
    %49 = vector.broadcast %48 : vector<2x8x1xf32> to vector<2x8x8xf32>
    %50 = arith.subf %46, %49 : vector<2x8x8xf32>
    %51 = math.exp %50 : vector<2x8x8xf32>
    %cst_18 = arith.constant dense<0.000000e+00> : vector<2x8xf32>
    %52 = vector.multi_reduction <add>, %51, %cst_18 [2] : vector<2x8x8xf32> to vector<2x8xf32>
    %53 = vector.shape_cast %52 : vector<2x8xf32> to vector<2x8x1xf32>
    %54 = tpu.reciprocal %53 {approx = true} : vector<2x8x1xf32> -> vector<2x8x1xf32>
    %55 = arith.mulf %53, %54 : vector<2x8x1xf32>
    %cst_19 = arith.constant 2.000000e+00 : f32
    %56 = vector.broadcast %cst_19 : f32 to vector<2x8x1xf32>
    %57 = arith.subf %56, %55 : vector<2x8x1xf32>
    %58 = arith.mulf %54, %57 : vector<2x8x1xf32>
    %59 = vector.broadcast %58 : vector<2x8x1xf32> to vector<2x8x8xf32>
    %60 = arith.mulf %51, %59 : vector<2x8x8xf32>
    "tpu.trace_start"() <{level = 10 : i32, message = "bqk,bkd->bqd"}> : () -> ()
    %cst_20 = arith.constant dense<0.000000e+00> : vector<2x8x8xf32>
    %61 = tpu.matmul %60, %44, %cst_20 {dimension_numbers = #tpu.dot_dimension_numbers<[2], [1], [1], [2], [0, 0, 0, 1, 1, 2], [0], [0]>} : vector<2x8x8xf32>, vector<2x8x8xf32>, vector<2x8x8xf32> -> vector<2x8x8xf32>
    "tpu.trace_stop"() : () -> ()
    %62 = vector.shape_cast %61 : vector<2x8x8xf32> to vector<16x8xf32>
    %63 = vector.extract_strided_slice %20 {offsets = [0, 0, 16], sizes = [2, 8, 8], strides = [1, 1, 1]} : vector<2x8x96xf32> to vector<2x8x8xf32>
    %64 = vector.extract_strided_slice %20 {offsets = [0, 0, 48], sizes = [2, 8, 8], strides = [1, 1, 1]} : vector<2x8x96xf32> to vector<2x8x8xf32>
    %65 = vector.extract_strided_slice %20 {offsets = [0, 0, 80], sizes = [2, 8, 8], strides = [1, 1, 1]} : vector<2x8x96xf32> to vector<2x8x8xf32>
    "tpu.trace_start"() <{level = 10 : i32, message = "bqd,bkd->bqk"}> : () -> ()
    %cst_21 = arith.constant dense<0.000000e+00> : vector<2x8x8xf32>
    %66 = tpu.matmul %63, %64, %cst_21 {dimension_numbers = #tpu.dot_dimension_numbers<[2], [2], [1], [1], [0, 0, 0, 1, 1, 1], [0], [0]>} : vector<2x8x8xf32>, vector<2x8x8xf32>, vector<2x8x8xf32> -> vector<2x8x8xf32>
    "tpu.trace_stop"() : () -> ()
    %67 = arith.addf %66, %15 : vector<2x8x8xf32>
    %cst_22 = arith.constant dense<0xFF800000> : vector<2x8xf32>
    %68 = vector.multi_reduction <maximumf>, %67, %cst_22 [2] : vector<2x8x8xf32> to vector<2x8xf32>
    %69 = vector.shape_cast %68 : vector<2x8xf32> to vector<2x8x1xf32>
    %70 = vector.broadcast %69 : vector<2x8x1xf32> to vector<2x8x8xf32>
    %71 = arith.subf %67, %70 : vector<2x8x8xf32>
    %72 = math.exp %71 : vector<2x8x8xf32>
    %cst_23 = arith.constant dense<0.000000e+00> : vector<2x8xf32>
    %73 = vector.multi_reduction <add>, %72, %cst_23 [2] : vector<2x8x8xf32> to vector<2x8xf32>
    %74 = vector.shape_cast %73 : vector<2x8xf32> to vector<2x8x1xf32>
    %75 = tpu.reciprocal %74 {approx = true} : vector<2x8x1xf32> -> vector<2x8x1xf32>
    %76 = arith.mulf %74, %75 : vector<2x8x1xf32>
    %cst_24 = arith.constant 2.000000e+00 : f32
    %77 = vector.broadcast %cst_24 : f32 to vector<2x8x1xf32>
    %78 = arith.subf %77, %76 : vector<2x8x1xf32>
    %79 = arith.mulf %75, %78 : vector<2x8x1xf32>
    %80 = vector.broadcast %79 : vector<2x8x1xf32> to vector<2x8x8xf32>
    %81 = arith.mulf %72, %80 : vector<2x8x8xf32>
    "tpu.trace_start"() <{level = 10 : i32, message = "bqk,bkd->bqd"}> : () -> ()
    %cst_25 = arith.constant dense<0.000000e+00> : vector<2x8x8xf32>
    %82 = tpu.matmul %81, %65, %cst_25 {dimension_numbers = #tpu.dot_dimension_numbers<[2], [1], [1], [2], [0, 0, 0, 1, 1, 2], [0], [0]>} : vector<2x8x8xf32>, vector<2x8x8xf32>, vector<2x8x8xf32> -> vector<2x8x8xf32>
    "tpu.trace_stop"() : () -> ()
    %83 = vector.shape_cast %82 : vector<2x8x8xf32> to vector<16x8xf32>
    %84 = vector.extract_strided_slice %20 {offsets = [0, 0, 24], sizes = [2, 8, 8], strides = [1, 1, 1]} : vector<2x8x96xf32> to vector<2x8x8xf32>
    %85 = vector.extract_strided_slice %20 {offsets = [0, 0, 56], sizes = [2, 8, 8], strides = [1, 1, 1]} : vector<2x8x96xf32> to vector<2x8x8xf32>
    %86 = vector.extract_strided_slice %20 {offsets = [0, 0, 88], sizes = [2, 8, 8], strides = [1, 1, 1]} : vector<2x8x96xf32> to vector<2x8x8xf32>
    "tpu.trace_start"() <{level = 10 : i32, message = "bqd,bkd->bqk"}> : () -> ()
    %cst_26 = arith.constant dense<0.000000e+00> : vector<2x8x8xf32>
    %87 = tpu.matmul %84, %85, %cst_26 {dimension_numbers = #tpu.dot_dimension_numbers<[2], [2], [1], [1], [0, 0, 0, 1, 1, 1], [0], [0]>} : vector<2x8x8xf32>, vector<2x8x8xf32>, vector<2x8x8xf32> -> vector<2x8x8xf32>
    "tpu.trace_stop"() : () -> ()
    %88 = arith.addf %87, %15 : vector<2x8x8xf32>
    %cst_27 = arith.constant dense<0xFF800000> : vector<2x8xf32>
    %89 = vector.multi_reduction <maximumf>, %88, %cst_27 [2] : vector<2x8x8xf32> to vector<2x8xf32>
    %90 = vector.shape_cast %89 : vector<2x8xf32> to vector<2x8x1xf32>
    %91 = vector.broadcast %90 : vector<2x8x1xf32> to vector<2x8x8xf32>
    %92 = arith.subf %88, %91 : vector<2x8x8xf32>
    %93 = math.exp %92 : vector<2x8x8xf32>
    %cst_28 = arith.constant dense<0.000000e+00> : vector<2x8xf32>
    %94 = vector.multi_reduction <add>, %93, %cst_28 [2] : vector<2x8x8xf32> to vector<2x8xf32>
    %95 = vector.shape_cast %94 : vector<2x8xf32> to vector<2x8x1xf32>
    %96 = tpu.reciprocal %95 {approx = true} : vector<2x8x1xf32> -> vector<2x8x1xf32>
    %97 = arith.mulf %95, %96 : vector<2x8x1xf32>
    %cst_29 = arith.constant 2.000000e+00 : f32
    %98 = vector.broadcast %cst_29 : f32 to vector<2x8x1xf32>
    %99 = arith.subf %98, %97 : vector<2x8x1xf32>
    %100 = arith.mulf %96, %99 : vector<2x8x1xf32>
    %101 = vector.broadcast %100 : vector<2x8x1xf32> to vector<2x8x8xf32>
    %102 = arith.mulf %93, %101 : vector<2x8x8xf32>
    "tpu.trace_start"() <{level = 10 : i32, message = "bqk,bkd->bqd"}> : () -> ()
    %cst_30 = arith.constant dense<0.000000e+00> : vector<2x8x8xf32>
    %103 = tpu.matmul %102, %86, %cst_30 {dimension_numbers = #tpu.dot_dimension_numbers<[2], [1], [1], [2], [0, 0, 0, 1, 1, 2], [0], [0]>} : vector<2x8x8xf32>, vector<2x8x8xf32>, vector<2x8x8xf32> -> vector<2x8x8xf32>
    "tpu.trace_stop"() : () -> ()
    %104 = vector.shape_cast %103 : vector<2x8x8xf32> to vector<16x8xf32>
    %105 = tpu.concatenate %41, %62, %83, %104 in 1 : vector<16x8xf32>, vector<16x8xf32>, vector<16x8xf32>, vector<16x8xf32> -> vector<16x32xf32>
    %c0_31 = arith.constant 0 : index
    %c0_32 = arith.constant 0 : index
    %106 = vector.load %arg3[%c0_31, %c0_32] : memref<32x32xf32, #tpu.memory_space<vmem>>, vector<32x32xf32>
    %cst_33 = arith.constant dense<0.000000e+00> : vector<16x32xf32>
    %107 = tpu.matmul %105, %106, %cst_33 {dimension_numbers = #tpu.dot_dimension_numbers<[1], [0], [0], [1], [0, 0, 1, 1], [], []>} : vector<16x32xf32>, vector<32x32xf32>, vector<16x32xf32> -> vector<16x32xf32>
    %108 = vector.broadcast %3 : vector<1x32xf32> to vector<16x32xf32>
    %109 = arith.addf %107, %108 : vector<16x32xf32>
    %110 = arith.addf %0, %109 : vector<16x32xf32>
    %cst_34 = arith.constant dense<0.000000e+00> : vector<16xf32>
    %111 = vector.multi_reduction <add>, %110, %cst_34 [1] : vector<16x32xf32> to vector<16xf32>
    %112 = vector.shape_cast %111 : vector<16xf32> to vector<16x1xf32>
    %cst_35 = arith.constant 3.200000e+01 : f32
    %113 = vector.broadcast %cst_35 : f32 to vector<16x1xf32>
    %114 = arith.divf %112, %113 : vector<16x1xf32>
    %115 = vector.broadcast %114 : vector<16x1xf32> to vector<16x32xf32>
    %116 = arith.subf %110, %115 : vector<16x32xf32>
    %117 = arith.mulf %116, %116 : vector<16x32xf32>
    %cst_36 = arith.constant dense<0.000000e+00> : vector<16xf32>
    %118 = vector.multi_reduction <add>, %117, %cst_36 [1] : vector<16x32xf32> to vector<16xf32>
    %119 = vector.shape_cast %118 : vector<16xf32> to vector<16x1xf32>
    %cst_37 = arith.constant 3.200000e+01 : f32
    %120 = vector.broadcast %cst_37 : f32 to vector<16x1xf32>
    %121 = arith.divf %119, %120 : vector<16x1xf32>
    %122 = vector.broadcast %114 : vector<16x1xf32> to vector<16x32xf32>
    %123 = arith.subf %110, %122 : vector<16x32xf32>
    %cst_38 = arith.constant 9.99999974E-6 : f32
    %124 = vector.broadcast %cst_38 : f32 to vector<16x1xf32>
    %125 = arith.addf %121, %124 : vector<16x1xf32>
    %126 = math.rsqrt %125 : vector<16x1xf32>
    %cst_39 = arith.constant 5.000000e-01 : f32
    %127 = vector.broadcast %cst_39 : f32 to vector<16x1xf32>
    %128 = arith.mulf %127, %125 : vector<16x1xf32>
    %129 = arith.mulf %128, %126 : vector<16x1xf32>
    %130 = arith.mulf %129, %126 : vector<16x1xf32>
    %cst_40 = arith.constant 1.500000e+00 : f32
    %131 = vector.broadcast %cst_40 : f32 to vector<16x1xf32>
    %132 = arith.subf %131, %130 : vector<16x1xf32>
    %133 = arith.mulf %126, %132 : vector<16x1xf32>
    %134 = vector.broadcast %133 : vector<16x1xf32> to vector<16x32xf32>
    %135 = arith.mulf %123, %134 : vector<16x32xf32>
    %136 = vector.broadcast %6 : vector<1x32xf32> to vector<16x32xf32>
    %137 = arith.mulf %135, %136 : vector<16x32xf32>
    %138 = vector.broadcast %7 : vector<1x32xf32> to vector<16x32xf32>
    %139 = arith.addf %137, %138 : vector<16x32xf32>
    %c0_41 = arith.constant 0 : index
    %c0_42 = arith.constant 0 : index
    %140 = vector.load %arg4[%c0_41, %c0_42] : memref<32x64xf32, #tpu.memory_space<vmem>>, vector<32x64xf32>
    %cst_43 = arith.constant dense<0.000000e+00> : vector<16x64xf32>
    %141 = tpu.matmul %139, %140, %cst_43 {dimension_numbers = #tpu.dot_dimension_numbers<[1], [0], [0], [1], [0, 0, 1, 1], [], []>} : vector<16x32xf32>, vector<32x64xf32>, vector<16x64xf32> -> vector<16x64xf32>
    %142 = vector.broadcast %4 : vector<1x64xf32> to vector<16x64xf32>
    %143 = arith.addf %141, %142 : vector<16x64xf32>
    %cst_44 = arith.constant 0.000000e+00 : f32
    %144 = vector.broadcast %cst_44 : f32 to vector<16x64xf32>
    %145 = arith.maximumf %143, %144 : vector<16x64xf32>
    %c0_45 = arith.constant 0 : index
    %c0_46 = arith.constant 0 : index
    %146 = vector.load %arg5[%c0_45, %c0_46] : memref<64x32xf32, #tpu.memory_space<vmem>>, vector<64x32xf32>
    %cst_47 = arith.constant dense<0.000000e+00> : vector<16x32xf32>
    %147 = tpu.matmul %145, %146, %cst_47 {dimension_numbers = #tpu.dot_dimension_numbers<[1], [0], [0], [1], [0, 0, 1, 1], [], []>} : vector<16x64xf32>, vector<64x32xf32>, vector<16x32xf32> -> vector<16x32xf32>
    %148 = vector.broadcast %5 : vector<1x32xf32> to vector<16x32xf32>
    %149 = arith.addf %147, %148 : vector<16x32xf32>
    %150 = arith.addf %139, %149 : vector<16x32xf32>
    %cst_48 = arith.constant dense<0.000000e+00> : vector<16xf32>
    %151 = vector.multi_reduction <add>, %150, %cst_48 [1] : vector<16x32xf32> to vector<16xf32>
    %152 = vector.shape_cast %151 : vector<16xf32> to vector<16x1xf32>
    %cst_49 = arith.constant 3.200000e+01 : f32
    %153 = vector.broadcast %cst_49 : f32 to vector<16x1xf32>
    %154 = arith.divf %152, %153 : vector<16x1xf32>
    %155 = vector.broadcast %154 : vector<16x1xf32> to vector<16x32xf32>
    %156 = arith.subf %150, %155 : vector<16x32xf32>
    %157 = arith.mulf %156, %156 : vector<16x32xf32>
    %cst_50 = arith.constant dense<0.000000e+00> : vector<16xf32>
    %158 = vector.multi_reduction <add>, %157, %cst_50 [1] : vector<16x32xf32> to vector<16xf32>
    %159 = vector.shape_cast %158 : vector<16xf32> to vector<16x1xf32>
    %cst_51 = arith.constant 3.200000e+01 : f32
    %160 = vector.broadcast %cst_51 : f32 to vector<16x1xf32>
    %161 = arith.divf %159, %160 : vector<16x1xf32>
    %162 = vector.broadcast %154 : vector<16x1xf32> to vector<16x32xf32>
    %163 = arith.subf %150, %162 : vector<16x32xf32>
    %cst_52 = arith.constant 9.99999974E-6 : f32
    %164 = vector.broadcast %cst_52 : f32 to vector<16x1xf32>
    %165 = arith.addf %161, %164 : vector<16x1xf32>
    %166 = math.rsqrt %165 : vector<16x1xf32>
    %cst_53 = arith.constant 5.000000e-01 : f32
    %167 = vector.broadcast %cst_53 : f32 to vector<16x1xf32>
    %168 = arith.mulf %167, %165 : vector<16x1xf32>
    %169 = arith.mulf %168, %166 : vector<16x1xf32>
    %170 = arith.mulf %169, %166 : vector<16x1xf32>
    %cst_54 = arith.constant 1.500000e+00 : f32
    %171 = vector.broadcast %cst_54 : f32 to vector<16x1xf32>
    %172 = arith.subf %171, %170 : vector<16x1xf32>
    %173 = arith.mulf %166, %172 : vector<16x1xf32>
    %174 = vector.broadcast %173 : vector<16x1xf32> to vector<16x32xf32>
    %175 = arith.mulf %163, %174 : vector<16x32xf32>
    %176 = vector.broadcast %8 : vector<1x32xf32> to vector<16x32xf32>
    %177 = arith.mulf %175, %176 : vector<16x32xf32>
    %178 = vector.broadcast %9 : vector<1x32xf32> to vector<16x32xf32>
    %179 = arith.addf %177, %178 : vector<16x32xf32>
    %c0_55 = arith.constant 0 : index
    %c0_56 = arith.constant 0 : index
    %180 = vector.load %arg7[%c0_55, %c0_56] : memref<16x32xf32, #tpu.memory_space<vmem>>, vector<16x32xf32>
    tpu.vector_store %arg7[%c0_55, %c0_56], %179 {strides = array<i32>} : memref<16x32xf32, #tpu.memory_space<vmem>>, vector<16x32xf32>,
    return
  }
}

</mosaic_0001>

<bundles_post_ra>
// kernel: encoder_layer.1
= control target key start
LH: loop header
LB: loop body
LE: loop exit
PB: predicated region body
PF: predicated region fallthrough
CT: control target
= control target key end

     0   :  { %12 = vsyncpa [#allocation3], 0  ;;  %s2678_s0 = inlined_call_operand.hbm [shape: f32[16,32], index: 0, kind: input, shape index: {}]   ;;  %s2679_s1 = inlined_call_operand.hbm [shape: f32[2,8,8], index: 1, kind: input, shape index: {}]   ;;  %s2680_s2 = inlined_call_operand.vmem [shape: f32[32,96], index: 2, kind: input, shape index: {}]   ;;  %s2681_s3 = inlined_call_operand.vmem [shape: f32[32,32], index: 3, kind: input, shape index: {}]   ;;  %s2682_s4 = inlined_call_operand.vmem [shape: f32[32,64], index: 4, kind: input, shape index: {}]   ;;  %s2683_s5 = inlined_call_operand.vmem [shape: f32[64,32], index: 5, kind: input, shape index: {}]   ;;  %s2684_s6 = inlined_call_operand.vmem [shape: f32[8,128], index: 6, kind: input, shape index: {}]   ;;  %s2685_s7 = inlined_call_operand.hbm [shape: f32[16,32], index: 7, kind: output, shape index: {}]  }
   0x1   :  { %13 = vsyncpa [#allocation6], 0 }
   0x2   :  { %14 = vsyncpa [#allocation4], 0  ;;  %s2320_s24 = smov [#allocation2]   ;;  %s2248_s28 = scalar_lea.hbm %s2678_s0, 256 }
   0x3   :  { %s20_s25 = sshll.u32 %s2320_s24, 4  ;;  %p2249_p0 = scmp.ne.s32.totalorder %s2678_s0, %s2248_s28  ;;  %s21_s25 = int_to_ptr.vmem [resolvable:$true] %s20_s25 }
   0x4   :  { %p2252_p1 = scmp.lt.u32.totalorder %s2248_s28, %s2678_s0 }
   0x6   :  { %p2254_p2 = pnand %p2252_p1, %p2249_p0 }
   0x8   :  { %2257 = shalt.err (!%p2254_p2)
}
   0x9   :  { %s2258_s10 = scalar_lea.vmem %s21_s25, 256  ;;  %p2263_p4 = scmp.lt.s32.totalorder %s21_s25, %s21_s25 }
   0xa   :  { %p2259_p3 = scmp.ne.s32.totalorder %s21_s25, %s2258_s10  ;;  %p2264_p5 = scmp.lt.s32.totalorder %s2258_s10, %s2258_s10 }
   0xc   :  { %p2265_p6 = por %p2264_p5, %p2263_p4 }
   0xe   :  { %p2266_p7 = pnand %p2265_p6, %p2259_p3 }
  0x10   :  { %2269 = shalt.err (!%p2266_p7)
}
  0x11   :  { %s2321_s11 = smov 128   ;;  %s2322_s12 = smov 8  }
  0x12   :  { %26 = dma.hbm_to_vmem [thread:$0]  %s2678_s0, 256, %s21_s25, [#allocation3], %s2321_s11, %s2321_s11, %s2322_s12  }
  0x13   :  { %s2323_s15 = smov [#allocation5]   ;;  %s2270_s19 = scalar_lea.hbm %s2679_s1, 256 }
  0x14   :  { %s32_s16 = sshll.u32 %s2323_s15, 4  ;;  %p2271_p8 = scmp.ne.s32.totalorder %s2679_s1, %s2270_s19  ;;  %s33_s16 = int_to_ptr.vmem [resolvable:$true] %s32_s16 }
  0x15   :  { %p2274_p9 = scmp.lt.u32.totalorder %s2270_s19, %s2679_s1 }
  0x17   :  { %p2276_p10 = pnand %p2274_p9, %p2271_p8 }
  0x19   :  { %2279 = shalt.err (!%p2276_p10)
}
  0x1a   :  { %s2280_s24 = scalar_lea.vmem %s33_s16, 256  ;;  %p2285_p12 = scmp.lt.s32.totalorder %s33_s16, %s33_s16 }
  0x1b   :  { %p2281_p11 = scmp.ne.s32.totalorder %s33_s16, %s2280_s24  ;;  %p2286_p13 = scmp.lt.s32.totalorder %s2280_s24, %s2280_s24 }
  0x1d   :  { %p2287_p0 = por %p2286_p13, %p2285_p12 }
  0x1f   :  { %p2288_p1 = pnand %p2287_p0, %p2281_p11 }
  0x21   :  { %2291 = shalt.err (!%p2288_p1)
}
  0x22   :  { %38 = dma.hbm_to_vmem [thread:$0]  %s2679_s1, 256, %s33_s16, [#allocation6], %s2321_s11, %s2321_s11, %s2322_s12  }
  0x23   :  { %2314 = dma.done.wait [#allocation3], 256  }
  0x24   :  { %2315 = vsyncadd [#allocation3], 4294967040 }
  0x25   :  { %2316 = dma.done.wait [#allocation6], 256  }
  0x26   :  { %2317 = vsyncadd [#allocation6], 4294967040  ;;  %vm72_vm0 = vcmask 261120   ;;  %v64_v0 = vld [vmem:[%s2680_s2] sm:$0xff]  ;;  %v65_v1 = vld [vmem:[%s2680_s2 + $0x8] sm:$0xff]  ;;  %v2324_v8 = vmov 0.0   ;;  %v68_v9 = vlaneseq }
  0x27   :  { %v66_v2 = vld [vmem:[%s2680_s2 + $0x10] sm:$0xff]  ;;  %v2148_v3 = vpack.c.bf16 %v65_v1, %v64_v0  ;;  %v67_v4 = vld [vmem:[%s2680_s2 + $0x18] sm:$0xff]  ;;  %v2422_v5 = vld [vmem:[#allocation2] sm:$0xff]  ;;  %2037 = vmatprep.subr.mxu0 %v2324_v8  ;;  %vm2325_vm1 = vmmov 0   ;;  %s2326_s13 = smov 96   ;;  %vm157_vm2 = vcmask 64512  }
  0x28   :  { %v2152_v6 = vpack.c.bf16 %v67_v4, %v66_v2  ;;  %2024 = vmatprep.mubr.msk.f32.mxu1 %vm72_vm0, %v2422_v5  ;;  %v2426_v7 = vld [vmem:[#allocation2 + $0x8] sm:$0xff]  ;;  %v2432_v10 = vshrl.u32 %v68_v9, 7  ;;  %2039 = vmatprep.mubr.msk.f32.mxu0 %vm2325_vm1, %v2324_v8  ;;  %v2442_v12 = vld [vmem:[%s2684_s6] sm:$0xff]  ;;  %v58_v20 = vld [vmem:[#allocation5] sm:$0xff]  ;;  %s2327_s6 = smov 64   ;;  %s2328_s14 = smov 88  }
  0x29   :  { %2149 = vmatprep.subr.bf16.mxu1 %v2148_v3  ;;  %vm60_vm3 = vcmp.eq.f32.partialorder %v58_v20, 0.0  ;;  %v59_v21 = vld [vmem:[#allocation5 + $0x8] sm:$0xff]  ;;  %s2329_s15 = smov 120   ;;  %s2330_s16 = smov 56   ;;  %vm1526_vm5 = vcmask 195584   ;;  %vm1523_vm6 = vcmask 130048  }
  0x2a   :  { %2151 = vmatpush3.bf16.msra.mxu1 %v2148_v3  ;;  %v70_v11 = vsub.s32 0, %v2432_v10  ;;  %v2464_v22 = vsel %vm60_vm3, -1e+09, %v2324_v8  ;;  %vm61_vm4 = vcmp.eq.f32.partialorder %v59_v21, 0.0  ;;  %s2331_s17 = smov 80   ;;  %s2332_s18 = smov 112  }
  0x2b   :  { %2153 = vmatprep.subr.bf16.mxu1 %v2152_v6  ;;  %v2468_v26 = vsel %vm61_vm4, -1e+09, %v2324_v8  ;;  %s2333_s19 = smov 48   ;;  %s2334_s20 = smov 72   ;;  %vm1772_vm7 = vcmask 523264  }
  0x2c   :  { %v71_v13 = vrot.slane %v2442_v12, %v70_v11  ;;  %s2335_s21 = smov 104   ;;  %s2336_s22 = smov 40  }
  0x2d   :  { %s2337_s23 = smov 16   ;;  %s2338_s8 = smov 24  }
  0x2e   :  { %2155 = vmatpush3.bf16.msra.mxu1 %v2152_v6 }
  0x2f   :  { %2027 = vmatprep.subr.mxu1 %v2324_v8 }
  0x31   :  { %2025 = vmatmul.mubr.msk.f32.vlgmr.msra.gmra.mrb[0].mxu1 %vm72_vm0, %v2426_v7 }
  0x32   :  { %2029 = vmatprep.mubr.msk.f32.mxu1 %vm2325_vm1, %v2324_v8 }
 0x104   :  { %v2026_v14 = vpop.f32.mrb[0].mxu1 }
 0x105   :  { %v145_v15 = vpop.f32.mrb[1].mxu1  ;;  %v2448_v17 = vadd.f32 %v2026_v14, %v71_v13 }
 0x106   :  { %v2445_v16 = vadd.f32 %v145_v15, %v71_v13 }
 0x108   :  { %155 = vrot.lane.b32.xlu0 %v2445_v16, %s2326_s13 }
 0x10c   :  { %233 = vrot.lane.b32.xlu0 %v2448_v17, %s2326_s13 }
 0x17a   :  { %v156_v18 = vpop.permute.xlu0 %155 }
 0x17b   :  { %2028 = vmatpush3.xpose.msk.msra.mxu1 %vm157_vm2, %v156_v18 }
 0x17c   :  { %2032 = vmatprep.subr.mxu1 %v2324_v8 }
 0x17e   :  { %2030 = vmatmul.mubr.msk.f32.vlgmr.msra.gmra.mrb[2].mxu1 %vm157_vm2, %v2445_v16  ;;  %v234_v19 = vpop.permute.xlu0 %233 }
 0x17f   :  { %2033 = vmatpush3.xpose.msk.msra.mxu1 %vm157_vm2, %v234_v19  ;;  %2034 = vmatprep.mubr.msk.f32.mxu1 %vm2325_vm1, %v2324_v8 }
 0x180   :  { %2042 = vmatprep.subr.mxu1 %v2324_v8 }
 0x182   :  { %2035 = vmatmul.mubr.msk.f32.vlgmr.msra.gmra.mrb[4].mxu1 %vm157_vm2, %v2448_v17 }
 0x183   :  { %2044 = vmatprep.mubr.msk.f32.mxu1 %vm2325_vm1, %v2324_v8 }
 0x251   :  { %v228_v23 = vpop.f32.mrb[2].mxu1 }
 0x252   :  { %v229_v24 = vadd.f32 %v228_v23, %v2464_v22  ;;  %v2031_v25 = vpop.f32.mrb[3].mxu1 }
 0x254   :  { %v309_v27 = vsel %vm157_vm2, %v229_v24, -inf }
 0x255   :  { %310 = vmax.xlane.f32.xlu1 %v309_v27  ;;  %v305_v28 = vpop.f32.mrb[4].mxu1 }
 0x256   :  { %v306_v29 = vadd.f32 %v305_v28, %v2468_v26  ;;  %v2036_v30 = vpop.f32.mrb[5].mxu1 }
 0x258   :  { %v312_v31 = vsel %vm157_vm2, %v306_v29, -inf }
 0x259   :  { %313 = vmax.xlane.f32.xlu1 %v312_v31 }
 0x26a   :  { %337 = vrot.lane.b32.xlu1 %v2445_v16, %s2327_s6 }
 0x26e   :  { %413 = vrot.lane.b32.xlu1 %v2448_v17, %s2327_s6 }
 0x272   :  { %491 = vrot.lane.b32.xlu1 %v2445_v16, %s2328_s14 }
 0x2e2   :  { %v311_v32 = vpop.xlane.xlu1 %310 }
 0x2e3   :  { %v315_v33 = vsub.f32 %v229_v24, %v311_v32 }
 0x2e5   :  { %v317_v34 = vmul.f32 1.442695, %v315_v33 }
 0x2e6   :  { %v314_v35 = vpop.xlane.xlu1 %313 }
 0x2e7   :  { %2208 = vpow2.f32 %v317_v34  ;;  %v316_v36 = vsub.f32 %v306_v29, %v314_v35 }
 0x2e9   :  { %v319_v37 = vmul.f32 1.442695, %v316_v36 }
 0x2ea   :  { %v338_v38 = vpop.permute.xlu1 %337 }
 0x2eb   :  { %2210 = vpow2.f32 %v319_v37  ;;  %2038 = vmatpush3.msra.mxu0 %v338_v38 }
 0x2ec   :  { %2047 = vmatprep.subr.mxu0 %v2324_v8 }
 0x2ee   :  { %v414_v39 = vpop.permute.xlu1 %413 }
 0x2ef   :  { %2043 = vmatpush3.msra.mxu1 %v414_v39 }
 0x2f0   :  { %2052 = vmatprep.subr.mxu1 %v2324_v8 }
 0x2f1   :  { %v2209_v40 = vpop.eup %2208 }
 0x2f2   :  { %v321_v41 = vsel %vm157_vm2, %v2209_v40, 0.0  ;;  %v492_v44 = vpop.permute.xlu1 %491 }
 0x2f3   :  { %322 = vadd.xlane.f32.xlu0 %v321_v41 }
 0x2f5   :  { %v2211_v42 = vpop.eup %2210 }
 0x2f6   :  { %v324_v43 = vsel %vm157_vm2, %v2211_v42, 0.0 }
 0x2f7   :  { %325 = vadd.xlane.f32.xlu1 %v324_v43 }
 0x308   :  { %569 = vrot.lane.b32.xlu1 %v2448_v17, %s2328_s14 }
 0x309   :  { %489 = vrot.lane.b32.xlu0 %v2445_v16, %s2329_s15 }
 0x30c   :  { %567 = vrot.lane.b32.xlu1 %v2448_v17, %s2329_s15 }
 0x380   :  { %v323_v45 = vpop.xlane.xlu0 %322 }
 0x381   :  { %2212 = vrcp.f32 %v323_v45 }
 0x384   :  { %v326_v46 = vpop.xlane.xlu1 %325  ;;  %v490_v58 = vpop.permute.xlu0 %489 }
 0x385   :  { %2214 = vrcp.f32 %v326_v46 }
 0x388   :  { %v570_v56 = vpop.permute.xlu1 %569 }
 0x38b   :  { %v2213_v47 = vpop.eup %2212 }
 0x38c   :  { %v329_v48 = vmul.f32 %v2213_v47, %v323_v45  ;;  %v568_v59 = vpop.permute.xlu1 %567 }
 0x38e   :  { %v331_v49 = vsub.f32 2.0, %v329_v48 }
 0x38f   :  { %v2215_v50 = vpop.eup %2214 }
 0x390   :  { %v333_v51 = vmul.f32 %v2213_v47, %v331_v49  ;;  %v330_v52 = vmul.f32 %v2215_v50, %v326_v46 }
 0x392   :  { %v335_v53 = vmul.f32 %v2209_v40, %v333_v51  ;;  %v332_v54 = vsub.f32 2.0, %v330_v52 }
 0x394   :  { %v334_v55 = vmul.f32 %v2215_v50, %v332_v54  ;;  %2040 = vmatmul.mubr.msk.f32.vlgmr.msra.gmra.mrb[0].mxu0 %vm157_vm2, %v335_v53 }
 0x395   :  { %2048 = vmatpush3.xpose.msk.msra.mxu0 %vm157_vm2, %v492_v44  ;;  %2049 = vmatprep.mubr.msk.f32.mxu0 %vm2325_vm1, %v2324_v8 }
 0x396   :  { %v336_v57 = vmul.f32 %v2211_v42, %v334_v55  ;;  %2057 = vmatprep.subr.mxu0 %v2324_v8 }
 0x398   :  { %2045 = vmatmul.mubr.msk.f32.vlgmr.msra.gmra.mrb[6].mxu1 %vm157_vm2, %v336_v57  ;;  %2050 = vmatmul.mubr.msk.f32.vlgmr.msra.gmra.mrb[2].mxu0 %vm157_vm2, %v490_v58 }
 0x399   :  { %2053 = vmatpush3.xpose.msk.msra.mxu1 %vm157_vm2, %v570_v56  ;;  %2054 = vmatprep.mubr.msk.f32.mxu1 %vm2325_vm1, %v2324_v8 }
 0x39a   :  { %2062 = vmatprep.subr.mxu1 %v2324_v8  ;;  %2059 = vmatprep.mubr.msk.f32.mxu0 %vm2325_vm1, %v2324_v8 }
 0x39c   :  { %2055 = vmatmul.mubr.msk.f32.vlgmr.msra.gmra.mrb[8].mxu1 %vm157_vm2, %v568_v59 }
 0x39d   :  { %2064 = vmatprep.mubr.msk.f32.mxu1 %vm2325_vm1, %v2324_v8 }
 0x467   :  { %v2499_v60 = vpop.f32.mrb[0].mxu0 }
 0x468   :  { %v2041_v61 = vpop.f32.mrb[1].mxu0 }
 0x46b   :  { %v2501_v62 = vpop.f32.mrb[6].mxu1  ;;  %v563_v63 = vpop.f32.mrb[2].mxu0 }
 0x46c   :  { %v564_v0 = vadd.f32 %v563_v63, %v2464_v22  ;;  %v2046_v1 = vpop.f32.mrb[7].mxu1  ;;  %v2051_v2 = vpop.f32.mrb[3].mxu0 }
 0x46e   :  { %v645_v3 = vsel %vm157_vm2, %v564_v0, -inf }
 0x46f   :  { %v641_v4 = vpop.f32.mrb[8].mxu1  ;;  %646 = vmax.xlane.f32.xlu1 %v645_v3 }
 0x470   :  { %v642_v6 = vadd.f32 %v641_v4, %v2468_v26  ;;  %v2056_v9 = vpop.f32.mrb[9].mxu1 }
 0x472   :  { %v648_v11 = vsel %vm157_vm2, %v642_v6, -inf }
 0x473   :  { %649 = vmax.xlane.f32.xlu0 %v648_v11 }
 0x480   :  { %673 = vrot.lane.b32.xlu1 %v2445_v16, %s2330_s16 }
 0x484   :  { %827 = vrot.lane.b32.xlu1 %v2445_v16, %s2331_s17 }
 0x489   :  { %749 = vrot.lane.b32.xlu0 %v2448_v17, %s2330_s16 }
 0x48d   :  { %825 = vrot.lane.b32.xlu0 %v2445_v16, %s2332_s18 }
 0x4fc   :  { %v647_v13 = vpop.xlane.xlu1 %646 }
 0x4fd   :  { %v651_v14 = vsub.f32 %v564_v0, %v647_v13 }
 0x4ff   :  { %v653_v15 = vmul.f32 1.442695, %v651_v14 }
 0x500   :  { %v674_v18 = vpop.permute.xlu1 %673  ;;  %v650_v19 = vpop.xlane.xlu0 %649 }
 0x501   :  { %2216 = vpow2.f32 %v653_v15  ;;  %v652_v20 = vsub.f32 %v642_v6, %v650_v19  ;;  %2058 = vmatpush3.msra.mxu0 %v674_v18 }
 0x502   :  { %2067 = vmatprep.subr.mxu0 %v2324_v8 }
 0x503   :  { %v655_v21 = vmul.f32 1.442695, %v652_v20 }
 0x504   :  { %v750_v23 = vpop.permute.xlu0 %749  ;;  %v828_v29 = vpop.permute.xlu1 %827 }
 0x505   :  { %2218 = vpow2.f32 %v655_v21  ;;  %2063 = vmatpush3.msra.mxu1 %v750_v23 }
 0x506   :  { %2072 = vmatprep.subr.mxu1 %v2324_v8 }
 0x508   :  { %v826_v43 = vpop.permute.xlu0 %825 }
 0x50b   :  { %v2217_v24 = vpop.eup %2216 }
 0x50c   :  { %v657_v25 = vsel %vm157_vm2, %v2217_v24, 0.0 }
 0x50d   :  { %658 = vadd.xlane.f32.xlu1 %v657_v25 }
 0x50f   :  { %v2219_v27 = vpop.eup %2218 }
 0x510   :  { %v660_v28 = vsel %vm157_vm2, %v2219_v27, 0.0 }
 0x511   :  { %661 = vadd.xlane.f32.xlu1 %v660_v28 }
 0x522   :  { %905 = vrot.lane.b32.xlu1 %v2448_v17, %s2331_s17 }
 0x526   :  { %903 = vrot.lane.b32.xlu1 %v2448_v17, %s2332_s18 }
 0x59a   :  { %v659_v30 = vpop.xlane.xlu1 %658 }
 0x59b   :  { %2220 = vrcp.f32 %v659_v30 }
 0x59e   :  { %v662_v31 = vpop.xlane.xlu1 %661 }
 0x59f   :  { %2222 = vrcp.f32 %v662_v31 }
 0x5a2   :  { %v906_v41 = vpop.permute.xlu1 %905 }
 0x5a5   :  { %v2221_v32 = vpop.eup %2220 }
 0x5a6   :  { %v665_v33 = vmul.f32 %v2221_v32, %v659_v30  ;;  %v904_v44 = vpop.permute.xlu1 %903 }
 0x5a8   :  { %v667_v34 = vsub.f32 2.0, %v665_v33 }
 0x5a9   :  { %v2223_v35 = vpop.eup %2222 }
 0x5aa   :  { %v669_v36 = vmul.f32 %v2221_v32, %v667_v34  ;;  %v666_v37 = vmul.f32 %v2223_v35, %v662_v31 }
 0x5ac   :  { %v671_v38 = vmul.f32 %v2217_v24, %v669_v36  ;;  %v668_v39 = vsub.f32 2.0, %v666_v37 }
 0x5ae   :  { %v670_v40 = vmul.f32 %v2223_v35, %v668_v39  ;;  %2060 = vmatmul.mubr.msk.f32.vlgmr.msra.gmra.mrb[4].mxu0 %vm157_vm2, %v671_v38 }
 0x5af   :  { %2068 = vmatpush3.xpose.msk.msra.mxu0 %vm157_vm2, %v828_v29  ;;  %2069 = vmatprep.mubr.msk.f32.mxu0 %vm2325_vm1, %v2324_v8 }
 0x5b0   :  { %v672_v42 = vmul.f32 %v2219_v27, %v670_v40  ;;  %2077 = vmatprep.subr.mxu0 %v2324_v8 }
 0x5b2   :  { %2065 = vmatmul.mubr.msk.f32.vlgmr.msra.gmra.mrb[10].mxu1 %vm157_vm2, %v672_v42  ;;  %2070 = vmatmul.mubr.msk.f32.vlgmr.msra.gmra.mrb[6].mxu0 %vm157_vm2, %v826_v43 }
 0x5b3   :  { %2073 = vmatpush3.xpose.msk.msra.mxu1 %vm157_vm2, %v906_v41  ;;  %2074 = vmatprep.mubr.msk.f32.mxu1 %vm2325_vm1, %v2324_v8 }
 0x5b4   :  { %2082 = vmatprep.subr.mxu1 %v2324_v8  ;;  %2079 = vmatprep.mubr.msk.f32.mxu0 %vm2325_vm1, %v2324_v8 }
 0x5b6   :  { %2075 = vmatmul.mubr.msk.f32.vlgmr.msra.gmra.mrb[12].mxu1 %vm157_vm2, %v904_v44 }
 0x5b7   :  { %2084 = vmatprep.mubr.msk.f32.mxu1 %vm2325_vm1, %v2324_v8 }
 0x681   :  { %v2533_v45 = vpop.f32.mrb[4].mxu0 }
 0x682   :  { %v2061_v46 = vpop.f32.mrb[5].mxu0 }
 0x685   :  { %v2535_v47 = vpop.f32.mrb[10].mxu1  ;;  %v899_v48 = vpop.f32.mrb[6].mxu0 }
 0x686   :  { %v900_v49 = vadd.f32 %v899_v48, %v2464_v22  ;;  %v2066_v50 = vpop.f32.mrb[11].mxu1  ;;  %v2071_v51 = vpop.f32.mrb[7].mxu0 }
 0x688   :  { %v981_v52 = vsel %vm157_vm2, %v900_v49, -inf }
 0x689   :  { %v977_v53 = vpop.f32.mrb[12].mxu1  ;;  %982 = vmax.xlane.f32.xlu0 %v981_v52 }
 0x68a   :  { %v978_v54 = vadd.f32 %v977_v53, %v2468_v26  ;;  %v2076_v55 = vpop.f32.mrb[13].mxu1 }
 0x68c   :  { %v984_v56 = vsel %vm157_vm2, %v978_v54, -inf }
 0x68d   :  { %985 = vmax.xlane.f32.xlu1 %v984_v56 }
 0x69e   :  { %1009 = vrot.lane.b32.xlu1 %v2445_v16, %s2333_s19 }
 0x6a2   :  { %1163 = vrot.lane.b32.xlu1 %v2445_v16, %s2334_s20 }
 0x6a6   :  { %1241 = vrot.lane.b32.xlu1 %v2448_v17, %s2334_s20 }
 0x6aa   :  { %1239 = vrot.lane.b32.xlu1 %v2448_v17, %s2335_s21 }
 0x716   :  { %v983_v57 = vpop.xlane.xlu0 %982 }
 0x717   :  { %v987_v58 = vsub.f32 %v900_v49, %v983_v57 }
 0x719   :  { %v989_v59 = vmul.f32 1.442695, %v987_v58 }
 0x71a   :  { %v986_v61 = vpop.xlane.xlu1 %985 }
 0x71b   :  { %2224 = vpow2.f32 %v989_v59  ;;  %v988_v63 = vsub.f32 %v978_v54, %v986_v61 }
 0x71d   :  { %v991_v0 = vmul.f32 1.442695, %v988_v63 }
 0x71e   :  { %v1010_v1 = vpop.permute.xlu1 %1009 }
 0x71f   :  { %2226 = vpow2.f32 %v991_v0  ;;  %2078 = vmatpush3.msra.mxu0 %v1010_v1 }
 0x720   :  { %2087 = vmatprep.subr.mxu0 %v2324_v8 }
 0x722   :  { %v1164_v20 = vpop.permute.xlu1 %1163 }
 0x725   :  { %v2225_v2 = vpop.eup %2224 }
 0x726   :  { %v993_v3 = vsel %vm157_vm2, %v2225_v2, 0.0  ;;  %v1242_v28 = vpop.permute.xlu1 %1241 }
 0x727   :  { %994 = vadd.xlane.f32.xlu0 %v993_v3 }
 0x729   :  { %v2227_v4 = vpop.eup %2226 }
 0x72a   :  { %v996_v6 = vsel %vm157_vm2, %v2227_v4, 0.0  ;;  %v1240_v31 = vpop.permute.xlu1 %1239 }
 0x72b   :  { %997 = vadd.xlane.f32.xlu0 %v996_v6  ;;  %v1532_v6 = vld [vmem:[%s2681_s3 + $0x18] sm:$0xff] }
 0x741   :  { %1085 = vrot.lane.b32.xlu0 %v2448_v17, %s2333_s19 }
 0x745   :  { %1161 = vrot.lane.b32.xlu0 %v2445_v16, %s2335_s21 }
 0x7b4   :  { %v995_v9 = vpop.xlane.xlu0 %994 }
 0x7b5   :  { %2228 = vrcp.f32 %v995_v9 }
 0x7b8   :  { %v998_v11 = vpop.xlane.xlu0 %997 }
 0x7b9   :  { %2230 = vrcp.f32 %v998_v11 }
 0x7bc   :  { %v1086_v13 = vpop.permute.xlu0 %1085 }
 0x7bd   :  { %2083 = vmatpush3.msra.mxu1 %v1086_v13 }
 0x7be   :  { %2092 = vmatprep.subr.mxu1 %v2324_v8 }
 0x7bf   :  { %v2229_v14 = vpop.eup %2228 }
 0x7c0   :  { %v1001_v15 = vmul.f32 %v2229_v14, %v995_v9  ;;  %v1162_v30 = vpop.permute.xlu0 %1161 }
 0x7c2   :  { %v1003_v18 = vsub.f32 2.0, %v1001_v15 }
 0x7c3   :  { %v2231_v19 = vpop.eup %2230 }
 0x7c4   :  { %v1005_v21 = vmul.f32 %v2229_v14, %v1003_v18  ;;  %v1002_v23 = vmul.f32 %v2231_v19, %v998_v11 }
 0x7c6   :  { %v1007_v24 = vmul.f32 %v2225_v2, %v1005_v21  ;;  %v1004_v25 = vsub.f32 2.0, %v1002_v23  ;;  %v1530_v2 = vld [vmem:[%s2681_s3 + $0x8] sm:$0xff] }
 0x7c8   :  { %v1006_v27 = vmul.f32 %v2231_v19, %v1004_v25  ;;  %2080 = vmatmul.mubr.msk.f32.vlgmr.msra.gmra.mrb[8].mxu0 %vm157_vm2, %v1007_v24 }
 0x7c9   :  { %2088 = vmatpush3.xpose.msk.msra.mxu0 %vm157_vm2, %v1164_v20  ;;  %2089 = vmatprep.mubr.msk.f32.mxu0 %vm2325_vm1, %v2324_v8 }
 0x7ca   :  { %v1008_v29 = vmul.f32 %v2227_v4, %v1006_v27  ;;  %2097 = vmatprep.subr.mxu0 %v2324_v8  ;;  %v1531_v4 = vld [vmem:[%s2681_s3 + $0x10] sm:$0xff] }
 0x7cb   :  { %v2160_v9 = vpack.c.bf16 %v1532_v6, %v1531_v4 }
 0x7cc   :  { %2085 = vmatmul.mubr.msk.f32.vlgmr.msra.gmra.mrb[14].mxu1 %vm157_vm2, %v1008_v29  ;;  %2090 = vmatmul.mubr.msk.f32.vlgmr.msra.gmra.mrb[10].mxu0 %vm157_vm2, %v1162_v30 }
 0x7cd   :  { %2093 = vmatpush3.xpose.msk.msra.mxu1 %vm157_vm2, %v1242_v28  ;;  %2094 = vmatprep.mubr.msk.f32.mxu1 %vm2325_vm1, %v2324_v8 }
 0x7ce   :  { %2102 = vmatprep.subr.mxu1 %v2324_v8  ;;  %2099 = vmatprep.mubr.msk.f32.mxu0 %vm2325_vm1, %v2324_v8 }
 0x7d0   :  { %2095 = vmatmul.mubr.msk.f32.vlgmr.msra.gmra.mrb[16].mxu1 %vm157_vm2, %v1240_v31 }
 0x7d1   :  { %2104 = vmatprep.mubr.msk.f32.mxu1 %vm2325_vm1, %v2324_v8 }
 0x89b   :  { %v1081_v32 = vpop.f32.mrb[8].mxu0 }
 0x89c   :  { %v2081_v33 = vpop.f32.mrb[9].mxu0 }
 0x89f   :  { %v1157_v34 = vpop.f32.mrb[14].mxu1  ;;  %v1235_v35 = vpop.f32.mrb[10].mxu0 }
 0x8a0   :  { %v1236_v36 = vadd.f32 %v1235_v35, %v2464_v22  ;;  %v2086_v37 = vpop.f32.mrb[15].mxu1  ;;  %v2091_v38 = vpop.f32.mrb[11].mxu0 }
 0x8a2   :  { %v1317_v39 = vsel %vm157_vm2, %v1236_v36, -inf }
 0x8a3   :  { %v1313_v40 = vpop.f32.mrb[16].mxu1  ;;  %1318 = vmax.xlane.f32.xlu0 %v1317_v39 }
 0x8a4   :  { %v1314_v41 = vadd.f32 %v1313_v40, %v2468_v26  ;;  %v2096_v42 = vpop.f32.mrb[17].mxu1 }
 0x8a6   :  { %v1320_v43 = vsel %vm157_vm2, %v1314_v41, -inf }
 0x8a7   :  { %1321 = vmax.xlane.f32.xlu1 %v1320_v43 }
 0x8b8   :  { %1345 = vrot.lane.b32.xlu1 %v2445_v16, %s2336_s22 }
 0x8bc   :  { %1499 = vrot.lane.b32.xlu1 %v2533_v45, %s2322_s12 }
 0x8c0   :  { %1501 = vrot.lane.b32.xlu1 %v2535_v47, %s2322_s12 }
 0x8c4   :  { %1509 = vrot.lane.b32.xlu1 %v1157_v34, %s2337_s23 }
 0x930   :  { %v1319_v8 = vpop.xlane.xlu0 %1318 }
 0x931   :  { %v1323_v22 = vsub.f32 %v1236_v36, %v1319_v8 }
 0x933   :  { %v1325_v44 = vmul.f32 1.442695, %v1323_v22 }
 0x934   :  { %v1322_v46 = vpop.xlane.xlu1 %1321 }
 0x935   :  { %2232 = vpow2.f32 %v1325_v44  ;;  %v1324_v26 = vsub.f32 %v1314_v41, %v1322_v46 }
 0x937   :  { %v1327_v48 = vmul.f32 1.442695, %v1324_v26 }
 0x938   :  { %v1346_v49 = vpop.permute.xlu1 %1345 }
 0x939   :  { %2234 = vpow2.f32 %v1327_v48  ;;  %2098 = vmatpush3.msra.mxu0 %v1346_v49  ;;  %v1670_v48 = vld [vmem:[%s2682_s4 + $0x8] sm:$0xff] }
 0x93c   :  { %v1500_v18 = vpop.permute.xlu1 %1499 }
 0x93d   :  { %v1521_v21 = vsel %vm157_vm2, %v2499_v60, %v1500_v18  ;;  %v1665_v18 = vsub.s32 5, %v2432_v10 }
 0x93f   :  { %v2233_v50 = vpop.eup %2232 }
 0x940   :  { %v1329_v16 = vsel %vm157_vm2, %v2233_v50, 0.0  ;;  %v1502_v19 = vpop.permute.xlu1 %1501 }
 0x941   :  { %1330 = vadd.xlane.f32.xlu0 %v1329_v16  ;;  %v1522_v28 = vsel %vm157_vm2, %v2501_v62, %v1502_v19  ;;  %v1672_v16 = vld [vmem:[%s2682_s4 + $0x18] sm:$0xff] }
 0x943   :  { %v2235_v45 = vpop.eup %2234 }
 0x944   :  { %v1332_v51 = vsel %vm157_vm2, %v2235_v45, 0.0  ;;  %v1510_v23 = vpop.permute.xlu1 %1509 }
 0x945   :  { %1333 = vadd.xlane.f32.xlu0 %v1332_v51  ;;  %v1525_v29 = vsel %vm1523_vm6, %v1522_v28, %v1510_v23  ;;  %v1760_v51 = vld [vmem:[%s2683_s5] sm:$0xff] }
 0x95b   :  { %1421 = vrot.lane.b32.xlu0 %v2448_v17, %s2336_s22  ;;  %v1529_v17 = vld [vmem:[%s2681_s3] sm:$0xff] }
 0x95c   :  { %v2156_v3 = vpack.c.bf16 %v1530_v2, %v1529_v17 }
 0x95e   :  { %2157 = vmatprep.subr.bf16.mxu0 %v2156_v3 }
 0x95f   :  { %1507 = vrot.lane.b32.xlu0 %v1081_v32, %s2337_s23  ;;  %v1535_v32 = vsub.s32 1, %v2432_v10 }
 0x961   :  { %v1536_v33 = vrot.slane %v2442_v12, %v1535_v32 }
 0x9ce   :  { %v1331_v47 = vpop.xlane.xlu0 %1330 }
 0x9cf   :  { %2236 = vrcp.f32 %v1331_v47 }
 0x9d2   :  { %v1334_v52 = vpop.xlane.xlu0 %1333 }
 0x9d3   :  { %2238 = vrcp.f32 %v1334_v52 }
 0x9d6   :  { %v1422_v53 = vpop.permute.xlu0 %1421 }
 0x9d7   :  { %2103 = vmatpush3.msra.mxu1 %v1422_v53 }
 0x9d9   :  { %v2237_v54 = vpop.eup %2236 }
 0x9da   :  { %v1337_v55 = vmul.f32 %v2237_v54, %v1331_v47  ;;  %v1508_v20 = vpop.permute.xlu0 %1507  ;;  %v1761_v47 = vld [vmem:[%s2683_s5 + $0x8] sm:$0xff] }
 0x9db   :  { %v1524_v24 = vsel %vm1523_vm6, %v1521_v21, %v1508_v20  ;;  %v2172_v53 = vpack.c.bf16 %v1761_v47, %v1760_v51 }
 0x9dc   :  { %v1339_v56 = vsub.f32 2.0, %v1337_v55 }
 0x9dd   :  { %v2239_v57 = vpop.eup %2238 }
 0x9de   :  { %v1341_v58 = vmul.f32 %v2237_v54, %v1339_v56  ;;  %v1338_v59 = vmul.f32 %v2239_v57, %v1334_v52  ;;  %v1762_v52 = vld [vmem:[%s2683_s5 + $0x10] sm:$0xff]  ;;  %v1763_v54 = vld [vmem:[%s2683_s5 + $0x18] sm:$0xff]  ;;  %v1764_v56 = vld [vmem:[%s2683_s5 + $0x20] sm:$0xff] }
 0x9df   :  { %v2176_v55 = vpack.c.bf16 %v1763_v54, %v1762_v52 }
 0x9e0   :  { %v1343_v61 = vmul.f32 %v2233_v50, %v1341_v58  ;;  %v1340_v63 = vsub.f32 2.0, %v1338_v59  ;;  %v1671_v50 = vld [vmem:[%s2682_s4 + $0x10] sm:$0xff] }
 0x9e2   :  { %v1342_v0 = vmul.f32 %v2239_v57, %v1340_v63  ;;  %2100 = vmatmul.mubr.msk.f32.vlgmr.msra.gmra.mrb[12].mxu0 %vm157_vm2, %v1343_v61  ;;  %v1765_v57 = vld [vmem:[%s2683_s5 + $0x28] sm:$0xff] }
 0x9e3   :  { %2159 = vmatpush3.bf16.msra.mxu0 %v2156_v3  ;;  %v2180_v58 = vpack.c.bf16 %v1765_v57, %v1764_v56 }
 0x9e4   :  { %v1344_v1 = vmul.f32 %v2235_v45, %v1342_v0  ;;  %2161 = vmatprep.subr.bf16.mxu0 %v2160_v9  ;;  %v2168_v45 = vpack.c.bf16 %v1672_v16, %v1671_v50 }
 0x9e6   :  { %2105 = vmatmul.mubr.msk.f32.vlgmr.msra.gmra.mrb[18].mxu1 %vm157_vm2, %v1344_v1 }
 0x9e7   :  { %2163 = vmatpush3.bf16.msra.mxu0 %v2160_v9 }
 0x9e8   :  { %2173 = vmatprep.subr.bf16.mxu0 %v2172_v53 }
 0xab5   :  { %v1417_v11 = vpop.f32.mrb[12].mxu0 }
 0xab6   :  { %1515 = vrot.lane.b32.xlu0 %v1417_v11, %s2338_s8  ;;  %v2101_v13 = vpop.f32.mrb[13].mxu0  ;;  %v1659_v11 = vsub.s32 4, %v2432_v10 }
 0xab8   :  { %v1660_v21 = vrot.slane %v2442_v12, %v1659_v11 }
 0xab9   :  { %v1493_v14 = vpop.f32.mrb[18].mxu1 }
 0xaba   :  { %1517 = vrot.lane.b32.xlu1 %v1493_v14, %s2338_s8  ;;  %v2106_v15 = vpop.f32.mrb[19].mxu1 }
 0xb28   :  { %v1516_v25 = vpop.permute.xlu0 %1515 }
 0xb29   :  { %v1527_v27 = vsel %vm1526_vm5, %v1524_v24, %v1516_v25  ;;  %v1666_v25 = vrot.slane %v2442_v12, %v1665_v18 }
 0xb2a   :  { %2115 = vmatprep.mubr.msk.f32.mxu0 %vm72_vm0, %v1527_v27 }
 0xb2c   :  { %v1518_v30 = vpop.permute.xlu1 %1517 }
 0xb2d   :  { %v1528_v31 = vsel %vm1526_vm5, %v1525_v29, %v1518_v30 }
 0xb2e   :  { %2116 = vmatmul.mubr.msk.f32.vlgmr.msra.gmra.mrb[14].mxu0 %vm72_vm0, %v1528_v31 }
 0xb2f   :  { %2175 = vmatpush3.bf16.msra.mxu0 %v2172_v53 }
 0xb30   :  { %2177 = vmatprep.subr.bf16.mxu0 %v2176_v55 }
 0xb33   :  { %2179 = vmatpush3.bf16.msra.mxu0 %v2176_v55 }
 0xb34   :  { %2181 = vmatprep.subr.bf16.mxu0 %v2180_v58 }
 0xb37   :  { %2183 = vmatpush3.bf16.msra.mxu0 %v2180_v58 }
 0xc01   :  { %v2117_v60 = vpop.f32.mrb[14].mxu0 }
 0xc02   :  { %v1615_v34 = vadd.f32 %v2117_v60, %v1536_v33  ;;  %v1609_v35 = vpop.f32.mrb[15].mxu0  ;;  %v1767_v60 = vld [vmem:[%s2683_s5 + $0x38] sm:$0xff] }
 0xc03   :  { %v1610_v36 = vadd.f32 %v1609_v35, %v1536_v33  ;;  %v1766_v33 = vld [vmem:[%s2683_s5 + $0x30] sm:$0xff]  ;;  %v1675_v35 = vsub.s32 2, %v2432_v10  ;;  %s2339_s5 = smov [#allocation7]  }
 0xc04   :  { %v1619_v37 = vadd.f32 %v1615_v34, %v2426_v7  ;;  %v2184_v34 = vpack.c.bf16 %v1767_v60, %v1766_v33  ;;  %s1911_s29 = sshll.u32 %s2339_s5, 4  ;;  %s1912_s29 = int_to_ptr.vmem [resolvable:$true] %s1911_s29 }
 0xc05   :  { %v1618_v38 = vadd.f32 %v1610_v36, %v2422_v5  ;;  %v1669_v5 = vld [vmem:[%s2682_s4] sm:$0xff]  ;;  %v1676_v36 = vrot.slane %v2442_v12, %v1675_v35  ;;  %s2292_s30 = scalar_lea.vmem %s1912_s29, 256  ;;  %p2297_p3 = scmp.lt.s32.totalorder %s1912_s29, %s1912_s29 }
 0xc06   :  { %v1623_v39 = vsel %vm72_vm0, %v1619_v37, 0.0  ;;  %v2164_v49 = vpack.c.bf16 %v1670_v48, %v1669_v5  ;;  %2185 = vmatprep.subr.bf16.mxu0 %v2184_v34  ;;  %p2293_p2 = scmp.ne.s32.totalorder %s1912_s29, %s2292_s30  ;;  %p2298_p4 = scmp.lt.s32.totalorder %s2292_s30, %s2292_s30 }
 0xc07   :  { %1624 = vadd.xlane.f32.xlu1 %v1623_v39  ;;  %v1620_v62 = vsel %vm72_vm0, %v1618_v38, 0.0  ;;  %2187 = vmatpush3.bf16.msra.mxu0 %v2184_v34 }
 0xc08   :  { %1621 = vadd.xlane.f32.xlu0 %v1620_v62  ;;  %2165 = vmatprep.subr.bf16.mxu1 %v2164_v49  ;;  %p2299_p5 = por %p2298_p4, %p2297_p3 }
 0xc09   :  { %2167 = vmatpush3.bf16.msra.mxu1 %v2164_v49 }
 0xc0a   :  { %2169 = vmatprep.subr.bf16.mxu1 %v2168_v45  ;;  %p2300_p6 = pnand %p2299_p5, %p2293_p2 }
 0xc0d   :  { %2171 = vmatpush3.bf16.msra.mxu1 %v2168_v45 }
 0xc94   :  { %v1625_v40 = vpop.xlane.xlu1 %1624 }
 0xc95   :  { %v1628_v41 = vmul.f32 0.03125, %v1625_v40  ;;  %v1622_v42 = vpop.xlane.xlu0 %1621 }
 0xc96   :  { %v1627_v43 = vmul.f32 0.03125, %v1622_v42  ;;  %v1770_v42 = vsub.s32 3, %v2432_v10 }
 0xc97   :  { %v1630_v8 = vsub.f32 %v1619_v37, %v1628_v41 }
 0xc98   :  { %v1629_v22 = vsub.f32 %v1618_v38, %v1627_v43  ;;  %v1771_v43 = vrot.slane %v2442_v12, %v1770_v42 }
 0xc99   :  { %v1632_v26 = vmul.f32 %v1630_v8, %v1630_v8 }
 0xc9a   :  { %v1631_v44 = vmul.f32 %v1629_v22, %v1629_v22 }
 0xc9b   :  { %v1636_v7 = vsel %vm72_vm0, %v1632_v26, 0.0 }
 0xc9c   :  { %v1633_v46 = vsel %vm72_vm0, %v1631_v44, 0.0 }
 0xc9d   :  { %1634 = vadd.xlane.f32.xlu0 %v1633_v46 }
 0xca1   :  { %1637 = vadd.xlane.f32.xlu0 %v1636_v7 }
 0xd2a   :  { %v1635_v59 = vpop.xlane.xlu0 %1634 }
 0xd2b   :  { %v1639_v61 = vmul.f32 0.03125, %v1635_v59 }
 0xd2d   :  { %v1641_v63 = vadd.f32 1e-05, %v1639_v61 }
 0xd2e   :  { %v1638_v0 = vpop.xlane.xlu0 %1637 }
 0xd2f   :  { %2240 = vrsqrt.f32 %v1641_v63  ;;  %v1640_v1 = vmul.f32 0.03125, %v1638_v0  ;;  %v1645_v2 = vmul.f32 0.5, %v1641_v63 }
 0xd31   :  { %v1642_v17 = vadd.f32 1e-05, %v1640_v1 }
 0xd33   :  { %2242 = vrsqrt.f32 %v1642_v17  ;;  %v1646_v9 = vmul.f32 0.5, %v1642_v17 }
 0xd39   :  { %v2241_v3 = vpop.eup %2240 }
 0xd3a   :  { %v1647_v4 = vmul.f32 %v2241_v3, %v1645_v2 }
 0xd3c   :  { %v1649_v6 = vmul.f32 %v2241_v3, %v1647_v4 }
 0xd3d   :  { %v2243_v13 = vpop.eup %2242 }
 0xd3e   :  { %v1651_v14 = vsub.f32 1.5, %v1649_v6  ;;  %v1648_v15 = vmul.f32 %v2243_v13, %v1646_v9  ;;  %v1894_v9 = vsub.s32 6, %v2432_v10 }
 0xd40   :  { %v1653_v19 = vmul.f32 %v2241_v3, %v1651_v14  ;;  %v1650_v20 = vmul.f32 %v2243_v13, %v1648_v15  ;;  %v1900_v14 = vsub.s32 7, %v2432_v10 }
 0xd42   :  { %v1652_v23 = vsub.f32 1.5, %v1650_v20  ;;  %v1655_v24 = vmul.f32 %v1653_v19, %v1629_v22  ;;  %v1895_v19 = vrot.slane %v2442_v12, %v1894_v9 }
 0xd44   :  { %v1654_v27 = vmul.f32 %v2243_v13, %v1652_v23  ;;  %v1661_v28 = vmul.f32 %v1660_v21, %v1655_v24  ;;  %v1901_v23 = vrot.slane %v2442_v12, %v1900_v14 }
 0xd46   :  { %v1656_v29 = vmul.f32 %v1654_v27, %v1630_v8  ;;  %v1667_v30 = vadd.f32 %v1666_v25, %v1661_v28 }
 0xd48   :  { %v1662_v31 = vmul.f32 %v1660_v21, %v1656_v29  ;;  %2126 = vmatprep.mubr.msk.f32.mxu1 %vm72_vm0, %v1667_v30 }
 0xd4a   :  { %v1668_v32 = vadd.f32 %v1666_v25, %v1662_v31 }
 0xd4c   :  { %2127 = vmatmul.mubr.msk.f32.vlgmr.msra.gmra.mrb[20].mxu1 %vm72_vm0, %v1668_v32 }
 0xe1f   :  { %v2128_v37 = vpop.f32.mrb[20].mxu1 }
 0xe20   :  { %v1755_v38 = vadd.f32 %v2128_v37, %v1676_v36  ;;  %v1749_v39 = vpop.f32.mrb[21].mxu1 }
 0xe21   :  { %v1750_v62 = vadd.f32 %v1749_v39, %v1676_v36 }
 0xe22   :  { %v1759_v41 = vmax.f32 %v1755_v38, 0.0 }
 0xe23   :  { %v1758_v40 = vmax.f32 %v1750_v62, 0.0 }
 0xe25   :  { %2145 = vmatprep.mubr.msk.f32.mxu0 %vm1772_vm7, %v1758_v40 }
 0xe26   :  { %2146 = vmatmul.mubr.msk.f32.vlgmr.msra.gmra.mrb[16].mxu0 %vm1772_vm7, %v1759_v41 }
 0xef9   :  { %v2147_v8 = vpop.f32.mrb[16].mxu0 }
 0xefa   :  { %v1851_v22 = vadd.f32 %v2147_v8, %v1771_v43  ;;  %v1845_v44 = vpop.f32.mrb[17].mxu0 }
 0xefb   :  { %v1846_v46 = vadd.f32 %v1845_v44, %v1771_v43 }
 0xefc   :  { %v1855_v26 = vadd.f32 %v1851_v22, %v1668_v32 }
 0xefd   :  { %v1854_v7 = vadd.f32 %v1846_v46, %v1667_v30 }
 0xefe   :  { %v1859_v5 = vsel %vm72_vm0, %v1855_v26, 0.0 }
 0xeff   :  { %1860 = vadd.xlane.f32.xlu0 %v1859_v5  ;;  %v1856_v48 = vsel %vm72_vm0, %v1854_v7, 0.0 }
 0xf00   :  { %1857 = vadd.xlane.f32.xlu1 %v1856_v48 }
 0xf8c   :  { %v1861_v49 = vpop.xlane.xlu0 %1860 }
 0xf8d   :  { %v1863_v50 = vmul.f32 0.03125, %v1861_v49  ;;  %v1858_v16 = vpop.xlane.xlu1 %1857 }
 0xf8e   :  { %v1862_v45 = vmul.f32 0.03125, %v1858_v16 }
 0xf8f   :  { %v1865_v51 = vsub.f32 %v1855_v26, %v1863_v50 }
 0xf90   :  { %v1864_v47 = vsub.f32 %v1854_v7, %v1862_v45 }
 0xf91   :  { %v1867_v52 = vmul.f32 %v1865_v51, %v1865_v51 }
 0xf92   :  { %v1866_v53 = vmul.f32 %v1864_v47, %v1864_v47 }
 0xf93   :  { %v1871_v54 = vsel %vm72_vm0, %v1867_v52, 0.0 }
 0xf94   :  { %1872 = vadd.xlane.f32.xlu0 %v1871_v54  ;;  %v1868_v55 = vsel %vm72_vm0, %v1866_v53, 0.0 }
 0xf95   :  { %1869 = vadd.xlane.f32.xlu1 %v1868_v55 }
0x1021   :  { %v1873_v56 = vpop.xlane.xlu0 %1872 }
0x1022   :  { %v1875_v57 = vmul.f32 0.03125, %v1873_v56  ;;  %v1870_v58 = vpop.xlane.xlu1 %1869 }
0x1023   :  { %v1874_v59 = vmul.f32 0.03125, %v1870_v58 }
0x1024   :  { %v1877_v61 = vadd.f32 1e-05, %v1875_v57 }
0x1025   :  { %v1876_v63 = vadd.f32 1e-05, %v1874_v59 }
0x1026   :  { %2244 = vrsqrt.f32 %v1877_v61  ;;  %v1881_v0 = vmul.f32 0.5, %v1877_v61 }
0x1027   :  { %2246 = vrsqrt.f32 %v1876_v63  ;;  %v1880_v17 = vmul.f32 0.5, %v1876_v63 }
0x1030   :  { %v2245_v1 = vpop.eup %2244 }
0x1031   :  { %v2247_v2 = vpop.eup %2246  ;;  %v1883_v3 = vmul.f32 %v2245_v1, %v1881_v0 }
0x1032   :  { %v1882_v4 = vmul.f32 %v2247_v2, %v1880_v17 }
0x1033   :  { %v1885_v6 = vmul.f32 %v2245_v1, %v1883_v3 }
0x1034   :  { %v1884_v11 = vmul.f32 %v2247_v2, %v1882_v4 }
0x1035   :  { %v1887_v13 = vsub.f32 1.5, %v1885_v6 }
0x1036   :  { %v1886_v15 = vsub.f32 1.5, %v1884_v11 }
0x1037   :  { %v1889_v18 = vmul.f32 %v2245_v1, %v1887_v13 }
0x1038   :  { %v1888_v20 = vmul.f32 %v2247_v2, %v1886_v15 }
0x1039   :  { %v1891_v21 = vmul.f32 %v1889_v18, %v1865_v51 }
0x103a   :  { %v1890_v24 = vmul.f32 %v1888_v20, %v1864_v47 }
0x103b   :  { %v1897_v25 = vmul.f32 %v1895_v19, %v1891_v21 }
0x103c   :  { %v1896_v27 = vmul.f32 %v1895_v19, %v1890_v24 }
0x103d   :  { %v1903_v28 = vadd.f32 %v1901_v23, %v1897_v25 }
0x103e   :  { %v1902_v29 = vadd.f32 %v1901_v23, %v1896_v27 }
0x103f   :  { %1905 = vst.msk [vmem:[#allocation7 + $0x8] sm:$0xff] %vm72_vm0, %v1903_v28 }
0x1040   :  { %1904 = vst.msk [vmem:[#allocation7] sm:$0xff] %vm72_vm0, %v1902_v29 }
0x1041   :  { %2303 = shalt.err (!%p2300_p6)
}
0x1042   :  { %s2304_s9 = scalar_lea.hbm %s2685_s7, 256 }
0x1043   :  { %p2305_p7 = scmp.ne.s32.totalorder %s2685_s7, %s2304_s9  ;;  %p2308_p8 = scmp.lt.u32.totalorder %s2304_s9, %s2685_s7 }
0x1045   :  { %p2310_p9 = pnand %p2308_p8, %p2305_p7 }
0x1047   :  { %2313 = shalt.err (!%p2310_p9)
}
0x1048   :  { %1917 = dma.vmem_to_hbm [thread:$0]  %s1912_s29, 256, %s2685_s7, [#allocation4], %s2321_s11, %s2321_s11, %s2322_s12  }
0x1049   :  { %2318 = dma.done.wait [#allocation4], 256  }
0x104a   :  { %2319 = vsyncadd [#allocation4], 4294967040 }
0x104b   :  { %1921 = vsyncpa [#allocation3], 1 }
0x104c   :  { %1922 = vsyncpa [#allocation6], 1 }
0x104d   :  { %1923 = vsyncpa [#allocation4], 1 }

</bundles_post_ra>
